<compile_context>
chip_gen: v5e
topology: v5e:2x2
jax: 0.10.0
libtpu: 0.0.40
codegen_flags: <defaults>
</compile_context>

<pallas_src>
import jax
import jax.numpy as jnp
from jax.experimental import pallas as pl
from jax.experimental.pallas import tpu as pltpu


def _tpw_kernel(node_ref, edge_ref, nrep_ref, erep_ref, w_ref, out_ref):
    """Fused, lane-dense contraction.

    Per folded row g (F original rows packed along lanes):
      node_exp[g, r*A*E + a*E + e] = node_f[g, r*A + a]   (0/1 replication, MXU)
      edge_exp[g, r*A*E + a*E + e] = edge_f[g, r*E + e]   (0/1 replication, MXU)
      combined = node_exp * edge_exp                       (one full-width VPU mul)
      out_f[g, r*K + k] = sum_m combined[g, m] * w_blk[m, r*K + k]  (single MXU dot)
    """
    node_exp = jnp.dot(node_ref[...], nrep_ref[...],
                       preferred_element_type=jnp.float32)        # [TG, F*A*E]
    edge_exp = jnp.dot(edge_ref[...], erep_ref[...],
                       preferred_element_type=jnp.float32)        # [TG, F*A*E]
    combined = node_exp * edge_exp                                # f32, lane-dense
    w = w_ref[...].astype(jnp.float32)                            # [F*A*E, F*K]
    out = jnp.dot(combined, w, preferred_element_type=jnp.float32)
    out_ref[...] = out.astype(out_ref.dtype)


def tensor_product_weights_block(node_attrs, edge_feats, weights, *, block_rows=2048):
    """Pallas implementation of TensorProductWeightsBlock.forward.

    node_attrs: [B, A], edge_feats: [B, E], weights: [A, E, K] -> [B, K]
    """
    B, A = node_attrs.shape
    Bb, E = edge_feats.shape
    Aw, Ew, K = weights.shape
    assert B == Bb and A == Aw and E == Ew, "shape mismatch"

    out_dtype = node_attrs.dtype

    # Fold factor F: pack F consecutive batch rows into the lane axis so the
    # output tile width is a multiple of 128 lanes (unmasked stores).
    if K % 128 == 0:
        F = 1
    elif 128 % K == 0:
        F = 128 // K
    else:
        F = 1  # TODO(synk): K not a divisor/multiple of 128 -> skip lane folding.

    # Pad B to a multiple of F with zero rows (zero rows give zero outputs,
    # sliced off at the end; no cross-row reduction so padding is safe).
    Bp = ((B + F - 1) // F) * F
    if Bp != B:
        pad = Bp - B
        node_attrs = jnp.pad(node_attrs, ((0, pad), (0, 0)))
        edge_feats = jnp.pad(edge_feats, ((0, pad), (0, 0)))

    G = Bp // F                               # folded rows
    node_f = node_attrs.reshape(G, F * A)     # free row-major reshapes
    edge_f = edge_feats.reshape(G, F * E)

    # Constant operands, built once in the wrapper (tiny; VMEM-resident in kernel).
    # n_rep[r*A+a, r*A*E + a*E + e] = 1
    n_rep = jnp.kron(jnp.eye(F * A, dtype=node_f.dtype),
                     jnp.ones((1, E), dtype=node_f.dtype))                 # [F*A, F*A*E]
    # e_rep[r*E+e, r*A*E + a*E + e] = 1
    e_rep = jnp.kron(jnp.eye(F, dtype=edge_f.dtype),
                     jnp.kron(jnp.ones((1, A), dtype=edge_f.dtype),
                              jnp.eye(E, dtype=edge_f.dtype)))             # [F*E, F*A*E]
    # Block-diagonal weight: w_blk[r*A*E + m, r*K + k] = weights.reshape(A*E,K)[m, k]
    w2d = weights.reshape(A * E, K)
    w_blk = jnp.kron(jnp.eye(F, dtype=weights.dtype), w2d)                 # [F*A*E, F*K]

    # Tile selection over folded rows. Keep tiles large, but force >= 2 grid
    # steps whenever possible so both TensorCores get work on v7x.
    if G <= 8:
        tg = G
    else:
        tg_target = max(8, block_rows // F)
        n_steps = max(2, pl.cdiv(G, tg_target))
        tg = pl.cdiv(G, n_steps)
        tg = ((tg + 7) // 8) * 8              # sublane dim must be a multiple of 8

    grid = (pl.cdiv(G, tg),)

    out_f = pl.pallas_call(
        _tpw_kernel,
        out_shape=jax.ShapeDtypeStruct((G, F * K), out_dtype),
        grid=grid,
        in_specs=[
            pl.BlockSpec((tg, F * A), lambda i: (i, 0)),            # folded node attrs
            pl.BlockSpec((tg, F * E), lambda i: (i, 0)),            # folded edge feats
            pl.BlockSpec((F * A, F * A * E), lambda i: (0, 0)),     # node replication (resident)
            pl.BlockSpec((F * E, F * A * E), lambda i: (0, 0)),     # edge replication (resident)
            pl.BlockSpec((F * A * E, F * K), lambda i: (0, 0)),     # block-diag weights (resident)
        ],
        out_specs=pl.BlockSpec((tg, F * K), lambda i: (i, 0)),       # lane-dense output
        compiler_params=pltpu.CompilerParams(
            dimension_semantics=("parallel",),                       # shard batch axis across TCs
        ),
    )(node_f, edge_f, n_rep, e_rep, w_blk)

    out = out_f.reshape(Bp, K)
    if Bp != B:
        out = out[:B]
    return out


if __name__ == "__main__":
    # Small shapes consistent with a MACE model.
    num_edges = 256        # b (number of edges)
    num_elements = 4       # a (chemical elements)
    num_edge_feats = 8     # e (radial / Bessel features)
    num_feats_out = 32     # k (output channels)

    key = jax.random.PRNGKey(0)
    k1, k2, k3 = jax.random.split(key, 3)

    # One-hot node attributes (as MACE uses); the kernel also works for dense attrs.
    node_attrs = jax.nn.one_hot(
        jax.random.randint(k1, (num_edges,), 0, num_elements),
        num_elements, dtype=jnp.float32)
    edge_feats = jax.random.normal(k2, (num_edges, num_edge_feats), dtype=jnp.float32)

    # Xavier-uniform-style init (stand-in for torch.nn.init.xavier_uniform_).
    limit = (6.0 / (num_edge_feats + num_feats_out)) ** 0.5
    weights = jax.random.uniform(
        k3, (num_elements, num_edge_feats, num_feats_out),
        minval=-limit, maxval=limit, dtype=jnp.float32)

    # block_rows=512 so this small example still exercises a multi-step grid
    # (F=4 folding -> G=64 folded rows -> 2 tiles of 32).
    out = tensor_product_weights_block(node_attrs, edge_feats, weights, block_rows=512)
    jax.block_until_ready(out)

    # Reference: plain JAX einsum == PyTorch forward semantics.
    ref = jnp.einsum("be,ba,aek->bk", edge_feats, node_attrs, weights)
    assert out.shape == (num_edges, num_feats_out)
    assert jnp.allclose(out, ref, atol=1e-5, rtol=1e-5), float(jnp.max(jnp.abs(out - ref)))

    print("KERNEL_OK")
</pallas_src>

<mosaic_0001>
module attributes {stable_mosaic.version = 11 : i64} {
  func.func @_tpw_kernel(%arg0: i32, %arg1: memref<32x16xf32, #tpu.memory_space<vmem>>, %arg2: memref<32x32xf32, #tpu.memory_space<vmem>>, %arg3: memref<16x128xf32, #tpu.memory_space<vmem>>, %arg4: memref<32x128xf32, #tpu.memory_space<vmem>>, %arg5: memref<128x128xf32, #tpu.memory_space<vmem>>, %arg6: memref<32x128xf32, #tpu.memory_space<vmem>>) attributes {dimension_semantics = [#tpu.dimension_semantics<parallel>], iteration_bounds = array<i64: 2>, scalar_prefetch = 0 : i64, scratch_operands = 0 : i64, tpu.core_type = #tpu.core_type<tc>, window_params = [{transform_indices = @transform_0, window_bounds = array<i64: 32, 16>}, {transform_indices = @transform_1, window_bounds = array<i64: 32, 32>}, {pipeline_mode = #tpu.pipeline_mode<synchronous>, transform_indices = @transform_2, window_bounds = array<i64: 16, 128>}, {pipeline_mode = #tpu.pipeline_mode<synchronous>, transform_indices = @transform_3, window_bounds = array<i64: 32, 128>}, {pipeline_mode = #tpu.pipeline_mode<synchronous>, transform_indices = @transform_4, window_bounds = array<i64: 128, 128>}, {transform_indices = @transform_5, window_bounds = array<i64: 32, 128>}]} {
    %c0 = arith.constant 0 : index
    %c0_0 = arith.constant 0 : index
    %0 = vector.load %arg1[%c0, %c0_0] : memref<32x16xf32, #tpu.memory_space<vmem>>, vector<32x16xf32>
    %c0_1 = arith.constant 0 : index
    %c0_2 = arith.constant 0 : index
    %1 = vector.load %arg3[%c0_1, %c0_2] : memref<16x128xf32, #tpu.memory_space<vmem>>, vector<16x128xf32>
    %cst = arith.constant dense<0.000000e+00> : vector<32x128xf32>
    %2 = tpu.matmul %0, %1, %cst {dimension_numbers = #tpu.dot_dimension_numbers<[1], [0], [0], [1], [0, 0, 1, 1], [], []>} : vector<32x16xf32>, vector<16x128xf32>, vector<32x128xf32> -> vector<32x128xf32>
    %c0_3 = arith.constant 0 : index
    %c0_4 = arith.constant 0 : index
    %3 = vector.load %arg2[%c0_3, %c0_4] : memref<32x32xf32, #tpu.memory_space<vmem>>, vector<32x32xf32>
    %c0_5 = arith.constant 0 : index
    %c0_6 = arith.constant 0 : index
    %4 = vector.load %arg4[%c0_5, %c0_6] : memref<32x128xf32, #tpu.memory_space<vmem>>, vector<32x128xf32>
    %cst_7 = arith.constant dense<0.000000e+00> : vector<32x128xf32>
    %5 = tpu.matmul %3, %4, %cst_7 {dimension_numbers = #tpu.dot_dimension_numbers<[1], [0], [0], [1], [0, 0, 1, 1], [], []>} : vector<32x32xf32>, vector<32x128xf32>, vector<32x128xf32> -> vector<32x128xf32>
    %6 = arith.mulf %2, %5 : vector<32x128xf32>
    %c0_8 = arith.constant 0 : index
    %c0_9 = arith.constant 0 : index
    %7 = vector.load %arg5[%c0_8, %c0_9] : memref<128x128xf32, #tpu.memory_space<vmem>>, vector<128x128xf32>
    %cst_10 = arith.constant dense<0.000000e+00> : vector<32x128xf32>
    %8 = tpu.matmul %6, %7, %cst_10 {dimension_numbers = #tpu.dot_dimension_numbers<[1], [0], [0], [1], [0, 0, 1, 1], [], []>} : vector<32x128xf32>, vector<128x128xf32>, vector<32x128xf32> -> vector<32x128xf32>
    %c0_11 = arith.constant 0 : index
    %c0_12 = arith.constant 0 : index
    %9 = vector.load %arg6[%c0_11, %c0_12] : memref<32x128xf32, #tpu.memory_space<vmem>>, vector<32x128xf32>
    tpu.vector_store %arg6[%c0_11, %c0_12], %8 {strides = array<i32>} : memref<32x128xf32, #tpu.memory_space<vmem>>, vector<32x128xf32>,
    return
  }
  func.func @transform_0(%arg0: i32) -> (i32, i32) {
    %c0_i32 = arith.constant 0 : i32
    %c0_i32_0 = arith.constant 0 : i32
    return %arg0, %c0_i32 : i32, i32
  }
  func.func @transform_1(%arg0: i32) -> (i32, i32) {
    %c0_i32 = arith.constant 0 : i32
    %c0_i32_0 = arith.constant 0 : i32
    return %arg0, %c0_i32 : i32, i32
  }
  func.func @transform_2(%arg0: i32) -> (i32, i32) {
    %c0_i32 = arith.constant 0 : i32
    %c0_i32_0 = arith.constant 0 : i32
    %c0_i32_1 = arith.constant 0 : i32
    return %c0_i32, %c0_i32_0 : i32, i32
  }
  func.func @transform_3(%arg0: i32) -> (i32, i32) {
    %c0_i32 = arith.constant 0 : i32
    %c0_i32_0 = arith.constant 0 : i32
    %c0_i32_1 = arith.constant 0 : i32
    return %c0_i32, %c0_i32_0 : i32, i32
  }
  func.func @transform_4(%arg0: i32) -> (i32, i32) {
    %c0_i32 = arith.constant 0 : i32
    %c0_i32_0 = arith.constant 0 : i32
    %c0_i32_1 = arith.constant 0 : i32
    return %c0_i32, %c0_i32_0 : i32, i32
  }
  func.func @transform_5(%arg0: i32) -> (i32, i32) {
    %c0_i32 = arith.constant 0 : i32
    %c0_i32_0 = arith.constant 0 : i32
    return %arg0, %c0_i32 : i32, i32
  }
}

</mosaic_0001>

<bundles_post_ra>
// kernel: tpu_custom_call.1
= control target key start
LH: loop header
LB: loop body
LE: loop exit
PB: predicated region body
PF: predicated region fallthrough
CT: control target
= control target key end

     0   :  { %10 = vsyncpa [#allocation3], 0  ;;  %s933_s0 = inlined_call_operand.vmem [shape: f32[64,16], index: 0, kind: input, shape index: {}]   ;;  %s934_s1 = inlined_call_operand.vmem [shape: f32[64,32], index: 1, kind: input, shape index: {}]   ;;  %s935_s2 = inlined_call_operand.vmem [shape: f32[16,128], index: 2, kind: input, shape index: {}]   ;;  %s936_s3 = inlined_call_operand.hbm [shape: f32[32,128], index: 3, kind: input, shape index: {}]   ;;  %s937_s4 = inlined_call_operand.vmem [shape: f32[128,128], index: 4, kind: input, shape index: {}]   ;;  %s938_s5 = inlined_call_operand.hbm [shape: f32[64,128], index: 5, kind: output, shape index: {}]  }
   0x1   :  { %11 = vsyncpa [#allocation4], 0 }
   0x2   :  { %13 = vsyncpa [#allocation4 + $0x1], 0  ;;  %s762_s18 = smov 0   ;;  %s764_s19 = smov 0  }
   0x3   :  { %s766_s20 = smov 0   ;;  %s768_s21 = smov 0  }
   0x4 LB: > { %s783_s22 = sadd.s32 4294967295, %s725_s21   ;;  %s518_s23 = sadd.s32 4294967294, %s725_s21   ;;  %s725_s21 = sphi %s768_s21, %s944_s21   ;;  %s721_s20 = sphi %s766_s20, %s943_s20   ;;  %s717_s19 = sphi %s764_s19, %s942_s19   ;;  %s713_s18 = sphi %s762_s18, %s941_s18  }
   0x5   : > { %s787_s24 = sadd.s32 1, %s725_s21   ;;  %s141_s25 = sadd.s32 1, %s721_s20 }
   0x6   : > { %s138_s26 = ssub.s32 %s725_s21, %s787_s24  ;;  %p151_p0 = scmp.ne.s32.totalorder %s721_s20, %s717_s19 }
   0x7   : > { %p139_p1 = scmp.eq.s32.totalorder %s138_s26, 0  ;;  %p152_p2 = scmp.eq.s32.totalorder %s783_s22, 1 }
   0x8   : > { %p157_p3 = scmp.ne.s32.totalorder %s717_s19, %s713_s18  ;;  %p158_p4 = scmp.eq.s32.totalorder %s518_s23, 1 }
   0x9   : > { %s798_s27 = scalar_select %p139_p1, %s721_s20, %s141_s25  }
   0xa   : > { %p800_p5 = por %p152_p2, %p151_p0  ;;  %p804_p6 = por %p158_p4, %p157_p3 }
   0xb   : > { %p519_p7 = scmp.ge.s32.totalorder %s725_s21, 1  ;;  %p165_p8 = scmp.lt.s32.totalorder %s725_s21, 3 }
   0xc   : > { %p589_p9 = scmp.eq.s32.totalorder %s783_s22, 0  ;;  %s179_s7 = sshll.u32 %s936_s3, 4  ;;  %s180_s7 = int_to_ptr.hbm [resolvable:$true] %s179_s7 }
   0xd   : > { %p166_p10 = pnand %p519_p7, %p165_p8  ;;  %s727_s8 = smov [#allocation2]  }
   0xe   : > { %s181_s9 = sshll.u32 %s727_s8, 4  ;;  %s728_s10 = smov 128   ;;  %s182_s9 = int_to_ptr.vmem [resolvable:$true] %s181_s9 }
   0xf   : > { %p581_p11 = pneg %p166_p10  ;;  %s729_s11 = smov 8  }
  0x10   : > { %218 = sbr.rel (%p166_p10) target bundleno = 318 (0x13e), region = 40 }
  0x11   : > { %p582_p12 = pnand %p589_p9, %p581_p11 }
  0x13   : > { %584 = dma.hbm_to_vmem [thread:$0]  (!%p582_p12), %s180_s7, 512, %s182_s9, [#allocation3], %s728_s10, %s728_s10, %s729_s11  }
  0x15   : > { %704 = dma.done.wait (%p589_p9), [#allocation3], 512  }
  0x16   : > { %706 = vsyncadd (%p589_p9), [#allocation3], 4294966784  ;;  %s525_s12 = sshll.u32 %s783_s22, 2  ;;  %v320_v0 = vld [vmem:[#allocation2 + $0x18] sm:$0xff]  ;;  %v319_v1 = vld [vmem:[#allocation2 + $0x10] sm:$0xff]  ;;  %vm271_vm0 = vcmask 130048  }
  0x17   : > { %p253_p13 = scmp.lt.s32.totalorder %s525_s12, 7  ;;  %v270_v2 = vld [vmem:[%s935_s2 + $0x8] sm:$0xff]  ;;  %346 = vmatpush.msra.mxu1 %v320_v0  ;;  %v269_v3 = vld [vmem:[%s935_s2] sm:$0xff]  ;;  %v382_v7 = vld [vmem:[%s937_s4 + $0x78] sm:$0xff]  ;;  %vm321_vm1 = vcmask 261120   ;;  %s679_s8 = scalar_lea.hbm %s938_s5, 64 }
  0x18   : > { %298 = vmatpush.msra.mxu0 %v270_v2  ;;  %v318_v4 = vld [vmem:[#allocation2 + $0x8] sm:$0xff]  ;;  %v317_v6 = vld [vmem:[#allocation2] sm:$0xff]  ;;  %v381_v9 = vld [vmem:[%s937_s4 + $0x70] sm:$0xff]  ;;  %543 = vmatpush.msra.mxu2 %v382_v7 }
  0x19   : > { %s946_s12 = smov (!%p253_p13, %s525_s12), 7  ;;  %347 = vmatpush.msra.mxu1 %v319_v1  ;;  %v380_v10 = vld [vmem:[%s937_s4 + $0x68] sm:$0xff]  ;;  %544 = vmatpush.msra.mxu3 %v382_v7  ;;  %v379_v11 = vld [vmem:[%s937_s4 + $0x60] sm:$0xff]  ;;  %v378_v13 = vld [vmem:[%s937_s4 + $0x58] sm:$0xff] }
  0x1a   : > { %s526_s13 = sshll.u32 %s946_s12, 3  ;;  %299 = vmatpush.msra.mxu0 %v269_v3  ;;  %545 = vmatpush.msra.mxu2 %v381_v9  ;;  %v377_v14 = vld [vmem:[%s937_s4 + $0x50] sm:$0xff]  ;;  %v376_v16 = vld [vmem:[%s937_s4 + $0x48] sm:$0xff]  ;;  %v375_v17 = vld [vmem:[%s937_s4 + $0x40] sm:$0xff] }
  0x1b   : > { %s824_s16 = scalar_lea.vmem %s933_s0, %s526_s13  ;;  %s836_s7 = scalar_lea.vmem %s934_s1, %s526_s13  ;;  %348 = vmatpush.msra.mxu1 %v318_v4  ;;  %546 = vmatpush.msra.mxu3 %v381_v9  ;;  %v374_v19 = vld [vmem:[%s937_s4 + $0x38] sm:$0xff]  ;;  %v373_v20 = vld [vmem:[%s937_s4 + $0x30] sm:$0xff]  ;;  %v372_v22 = vld [vmem:[%s937_s4 + $0x28] sm:$0xff] }
  0x1c   : > { %v265_v5 = vld [vmem:[%s824_s16] sm:$0xff]  ;;  %383 = vmatpush.msrb.mxu0 %v382_v7  ;;  %v266_v12 = vld [vmem:[%s824_s16 + $0x8] sm:$0xff]  ;;  %547 = vmatpush.msra.mxu2 %v380_v10  ;;  %v267_v18 = vld [vmem:[%s824_s16 + $0x10] sm:$0xff]  ;;  %s542_s13 = sshll.u32 %s783_s22, 5 }
  0x1d   : > { %529 = vmatmul.msk.f32.vlgmr.msra.gmra.mxu0 %vm271_vm0, %v265_v5  ;;  %v313_v8 = vld [vmem:[%s836_s7] sm:$0xff]  ;;  %349 = vmatpush.msra.mxu1 %v317_v6  ;;  %v314_v15 = vld [vmem:[%s836_s7 + $0x8] sm:$0xff]  ;;  %v315_v21 = vld [vmem:[%s836_s7 + $0x10] sm:$0xff]  ;;  %s428_s17 = scalar_lea.hbm %s938_s5, %s542_s13 }
  0x1e   : > { %384 = vmatpush.msrb.mxu0 %v381_v9  ;;  %533 = vmatmul.msk.f32.vlgmr.msra.gmra.mxu1 %vm321_vm1, %v313_v8  ;;  %v371_v23 = vld [vmem:[%s937_s4 + $0x20] sm:$0xff]  ;;  %v268_v24 = vld [vmem:[%s824_s16 + $0x18] sm:$0xff]  ;;  %v369_v26 = vld [vmem:[%s937_s4 + $0x10] sm:$0xff]  ;;  %s431_s25 = sshll.u32 %s428_s17, 4  ;;  %s432_s25 = int_to_ptr.hbm [resolvable:$true] %s431_s25 }
  0x1f   : > { %548 = vmatpush.msra.mxu3 %v380_v10  ;;  %549 = vmatpush.msra.mxu2 %v379_v11  ;;  %v370_v25 = vld [vmem:[%s937_s4 + $0x18] sm:$0xff]  ;;  %v368_v28 = vld [vmem:[%s937_s4 + $0x8] sm:$0xff]  ;;  %v367_v29 = vld [vmem:[%s937_s4] sm:$0xff]  ;;  %s673_s30 = sshra.s32 %s432_s25, 4  ;;  %s674_s30 = int_to_ptr.hbm [resolvable:$true] %s673_s30 }
  0x20   : > { %385 = vmatpush.msrb.mxu0 %v380_v10  ;;  %v316_v27 = vld [vmem:[%s836_s7 + $0x18] sm:$0xff]  ;;  %s249_s7 = sand.u32 1, %s717_s19   ;;  %s675_s6 = scalar_lea.hbm %s674_s30, 32 }
  0x21   : > { %550 = vmatpush.msra.mxu3 %v379_v11  ;;  %551 = vmatpush.msra.mxu2 %v378_v13  ;;  %s524_s11 = sshll.u32 %s249_s7, 5  ;;  %s417_s26 = scalar_lea.sflag [#allocation4], %s249_s7 }
  0x22   : > { %386 = vmatpush.msrb.mxu0 %v379_v11  ;;  %s251_s12 = scalar_lea.vmem [#allocation5], %s524_s11  ;;  %p676_p0 = scmp.ne.s32.totalorder %s674_s30, %s675_s6 }
  0x23   : > { %552 = vmatpush.msra.mxu3 %v378_v13  ;;  %553 = vmatpush.msra.mxu2 %v377_v14  ;;  %s429_s23 = sshll.u32 %s251_s12, 4  ;;  %p680_p3 = scmp.lt.s32.totalorder %s674_s30, %s938_s5  ;;  %s430_s23 = int_to_ptr.vmem [resolvable:$true] %s429_s23 }
  0x24   : > { %387 = vmatpush.msrb.mxu0 %v378_v13  ;;  %p677_p1 = pnand %p676_p0, %p800_p5  ;;  %p681_p4 = scmp.lt.s32.totalorder %s679_s8, %s675_s6 }
  0x25   : > { %530 = vmatmul.msk.f32.gmra.mxu0 %vm271_vm0, %v266_v12  ;;  %554 = vmatpush.msra.mxu3 %v377_v14 }
  0x26   : > { %388 = vmatpush.msrb.mxu0 %v377_v14  ;;  %534 = vmatmul.msk.f32.gmra.mxu1 %vm321_vm1, %v314_v15  ;;  %p678_p2 = pneg %p677_p1  ;;  %p682_p7 = por %p681_p4, %p680_p3 }
  0x27   : > { %555 = vmatpush.msra.mxu2 %v376_v16  ;;  %556 = vmatpush.msra.mxu3 %v376_v16 }
  0x28   : > { %389 = vmatpush.msrb.mxu0 %v376_v16  ;;  %p683_p8 = pnand %p682_p7, %p678_p2 }
  0x29   : > { %557 = vmatpush.msra.mxu2 %v375_v17  ;;  %558 = vmatpush.msra.mxu3 %v375_v17 }
  0x2a   : > { %390 = vmatpush.msrb.mxu0 %v375_v17 }
  0x2b   : > { %559 = vmatpush.msra.mxu2 %v374_v19  ;;  %560 = vmatpush.msra.mxu3 %v374_v19 }
  0x2c   : > { %391 = vmatpush.msrb.mxu0 %v374_v19 }
  0x2d   : > { %531 = vmatmul.msk.f32.gmra.mxu0 %vm271_vm0, %v267_v18  ;;  %561 = vmatpush.msra.mxu2 %v373_v20 }
  0x2e   : > { %392 = vmatpush.msrb.mxu0 %v373_v20  ;;  %535 = vmatmul.msk.f32.gmra.mxu1 %vm321_vm1, %v315_v21 }
  0x2f   : > { %562 = vmatpush.msra.mxu3 %v373_v20  ;;  %563 = vmatpush.msra.mxu2 %v372_v22 }
  0x30   : > { %393 = vmatpush.msrb.mxu0 %v372_v22 }
  0x31   : > { %564 = vmatpush.msra.mxu3 %v372_v22  ;;  %565 = vmatpush.msra.mxu2 %v371_v23 }
  0x32   : > { %394 = vmatpush.msrb.mxu0 %v371_v23 }
  0x33   : > { %566 = vmatpush.msra.mxu3 %v371_v23  ;;  %567 = vmatpush.msra.mxu2 %v370_v25 }
  0x34   : > { %395 = vmatpush.msrb.mxu0 %v370_v25 }
  0x35   : > { %532 = vmatmul.msk.f32.gmra.mxu0 %vm271_vm0, %v268_v24  ;;  %568 = vmatpush.msra.mxu3 %v370_v25 }
  0x36   : > { %396 = vmatpush.msrb.mxu0 %v369_v26  ;;  %536 = vmatmul.msk.f32.gmra.mxu1 %vm321_vm1, %v316_v27 }
  0x37   : > { %569 = vmatpush.msra.mxu2 %v369_v26  ;;  %570 = vmatpush.msra.mxu3 %v369_v26 }
  0x38   : > { %397 = vmatpush.msrb.mxu0 %v368_v28 }
  0x39   : > { %571 = vmatpush.msra.mxu2 %v368_v28  ;;  %572 = vmatpush.msra.mxu3 %v368_v28 }
  0x3a   : > { %398 = vmatpush.msrb.mxu0 %v367_v29 }
  0x3b   : > { %573 = vmatpush.msra.mxu2 %v367_v29  ;;  %574 = vmatpush.msra.mxu3 %v367_v29 }
  0x9a   : > { %v301_v30 = vpop.f32.mrf.mxu0 }
  0x9b   : > { %v351_v31 = vpop.f32.mrf.mxu1 }
  0x9c   : > { %v363_v32 = vmul.f32 %v351_v31, %v301_v30 }
  0x9e   : > { %399 = vmatmul.f32.vlgmr.msrb.gmra.mxu0 %v363_v32 }
  0xa2   : > { %v304_v33 = vpop.f32.mrf.mxu0 }
  0xa3   : > { %v354_v34 = vpop.f32.mrf.mxu1 }
  0xa4   : > { %v364_v35 = vmul.f32 %v354_v34, %v304_v33 }
  0xa6   : > { %402 = vmatmul.f32.vlgmr.msra.gmra.mxu2 %v364_v35 }
  0xaa   : > { %v307_v36 = vpop.f32.mrf.mxu0 }
  0xab   : > { %v357_v37 = vpop.f32.mrf.mxu1 }
  0xac   : > { %v365_v38 = vmul.f32 %v357_v37, %v307_v36 }
  0xae   : > { %405 = vmatmul.f32.vlgmr.msra.gmra.mxu3 %v365_v38 }
  0xb2   : > { %v310_v39 = vpop.f32.mrf.mxu0 }
  0xb3   : > { %v360_v40 = vpop.f32.mrf.mxu1 }
  0xb4   : > { %v366_v41 = vmul.f32 %v360_v40, %v310_v39 }
  0xb6   : > { %408 = vmatmul.f32.gmra.mxu3 %v366_v41 }
 0x11b   : > { %v400_v42 = vpop.f32.mrf.mxu0 }
 0x11c   : > { %412 = vst [vmem:[%s251_s12] sm:$0xff] %v400_v42 }
 0x129   : > { %v403_v43 = vpop.f32.mrf.mxu2 }
 0x12a   : > { %413 = vst [vmem:[%s251_s12 + $0x8] sm:$0xff] %v403_v43 }
 0x131   : > { %v406_v44 = vpop.f32.mrf.mxu3 }
 0x132   : > { %414 = vst [vmem:[%s251_s12 + $0x10] sm:$0xff] %v406_v44 }
 0x139   : > { %v409_v45 = vpop.f32.mrf.mxu3 }
 0x13a   : > { %415 = vst [vmem:[%s251_s12 + $0x18] sm:$0xff] %v409_v45 }
 0x13b   : > { %686 = shalt.err (!%p683_p8)
}
 0x13c   : > { %s730_s7 = smov 128   ;;  %s731_s11 = smov 8  }
 0x13d   : > { %579 = dma.vmem_to_hbm [thread:$0]  (%p800_p5), %s430_s23, 512, %s432_s25, %s417_s26, %s730_s7, %s730_s7, %s731_s11  }
 0x13e PF: > { %p591_p9 = scmp.ge.s32.totalorder %s725_s21, 2  ;;  %s446_s12 = sand.u32 1, %s713_s18  }
 0x13f   : > { %s447_s13 = scalar_lea.sflag [#allocation4], %s446_s12 }
 0x140   : > { %p586_p10 = pnand %p591_p9, %p804_p6 }
 0x142   : > { %p587_p11 = pneg %p586_p10 }
 0x144   : > { %708 = dma.done.wait (%p587_p11), %s447_s13, 512  }
 0x145   : > { %710 = vsyncadd (%p587_p11), %s447_s13, 4294966784  ;;  %p16_p12 = scmp.ge.s32.totalorder %s787_s24, 4   ;;  %s941_s18 = smov %s717_s19 }
 0x146   : > { %s942_s19 = smov %s721_s20  ;;  %s943_s20 = smov %s798_s27 }
 0x147   : > { %s944_s21 = smov %s787_s24  ;;  %18 = sbr.rel (!%p16_p12) target bundleno = 4 (0x4), region = 83 }
 0x14c   :  { %453 = vsyncpa [#allocation3], 1 }
 0x14d   :  { %455 = vsyncpa [#allocation3 + $0x1], 1 }
 0x14e   :  { %456 = vsyncpa [#allocation4], 1 }
 0x14f   :  { %458 = vsyncpa [#allocation4 + $0x1], 1 }

</bundles_post_ra>
